<compile_context>
chip_gen: v7x
topology: tpu7x:2x2x1
jax: 0.10.0
libtpu: 0.0.40
codegen_flags: <defaults>
</compile_context>

<pallas_src>
import jax
import jax.numpy as jnp
from jax.experimental import pallas as pl
from jax.experimental.pallas import tpu as pltpu


# ----------------------------- Pallas kernel -------------------------------

def _uniform_bounds_kernel(h_ref, low_ref, high_ref):
    h = h_ref[...]
    half = jnp.asarray(0.5, dtype=h.dtype)
    low_ref[...] = h - half
    high_ref[...] = h + half


# --------------------------- layout / budgeting ----------------------------

_LANE_CANDIDATES = (4096, 2048, 1024, 512, 256, 128)


def _round_down(x: int, m: int) -> int:
    return (x // m) * m


def _plan_layout(n: int):
    """Pick a pad-free, lane-dense (rows, lanes) factorization of n.

    Prefers the widest lane dim whose row count is a multiple of 8 (clean
    sublane tiling), then any exact 128-multiple factorization.  Returns
    None when n is not divisible by 128 (caller falls back to plain XLA).
    """
    best = None
    for lanes in _LANE_CANDIDATES:
        if n % lanes == 0:
            rows = n // lanes
            if rows % 8 == 0:
                return rows, lanes
            if best is None:
                best = (rows, lanes)
    return best


def _vmem_budget():
    """(vmem_limit_bytes, target_block_bytes_per_array) for this generation."""
    try:
        vmem_cap = pltpu.get_tpu_info().vmem_capacity_bytes
    except Exception:  # not a TPU / interpret mode: be conservative
        vmem_cap = 64 << 20
    if vmem_cap >= (96 << 20):
        # v5e / v6e: 128 MiB physical VMEM.
        return 64 << 20, 8 << 20
    # v7x: 64 MiB physical VMEM -> leave headroom for compiler scratch.
    return 40 << 20, 4 << 20


# ------------------------------ public wrapper -----------------------------

def uniform_bounds(h: jax.Array, *, donate_input: bool = False):
    """Compute (h - 0.5, h + 0.5); Pallas kernel on the lane-aligned fast path.

    Set donate_input=True only when the caller no longer needs `h` (the low
    output is then aliased onto h's buffer, removing one HBM allocation).
    """
    orig_shape = h.shape
    dtype = h.dtype
    n = h.size

    # Non-float inputs or sizes not divisible by 128: a single fused XLA pass
    # is already HBM-roofline optimal for this stream; padding would only add
    # extra full passes over the data.
    if n == 0 or not jnp.issubdtype(dtype, jnp.floating):
        return h - 0.5, h + 0.5
    plan = _plan_layout(n)
    if plan is None:
        return h - 0.5, h + 0.5

    rows, lanes = plan
    itemsize = jnp.dtype(dtype).itemsize
    vmem_limit, target_block_bytes = _vmem_budget()

    bytes_per_row = lanes * itemsize
    block_rows = max(32, _round_down(target_block_bytes // bytes_per_row, 32))

    # Guarantee >= ~8 grid steps on big tensors so both v7x TensorCores get
    # work and double-buffering hides the DMA on every generation.
    min_steps = 8
    if rows >= min_steps * 8:
        cap = max(8, _round_down(rows // min_steps, 8))
        block_rows = min(block_rows, cap)
    if block_rows >= rows:
        block_rows = rows  # full-extent block (exempt from the (8,128) rule)

    grid = (pl.cdiv(rows, block_rows),)
    spec = pl.BlockSpec((block_rows, lanes), lambda i: (i, 0))

    h2d = h.reshape(rows, lanes)  # contiguous row-major reshape: no HBM copy

    low2d, high2d = pl.pallas_call(
        _uniform_bounds_kernel,
        out_shape=(
            jax.ShapeDtypeStruct((rows, lanes), dtype),
            jax.ShapeDtypeStruct((rows, lanes), dtype),
        ),
        grid_spec=pltpu.PrefetchScalarGridSpec(
            num_scalar_prefetch=0,
            grid=grid,
            in_specs=[spec],
            out_specs=[spec, spec],
        ),
        compiler_params=pltpu.CompilerParams(
            dimension_semantics=("parallel",),
            vmem_limit_bytes=vmem_limit,
        ),
        cost_estimate=pl.CostEstimate(
            flops=2 * n, transcendentals=0, bytes_accessed=3 * n * itemsize
        ),
        input_output_aliases=({0: 0} if donate_input else {}),
    )(h2d)

    return low2d.reshape(orig_shape), high2d.reshape(orig_shape)


# ------------------------ Uniform distribution glue ------------------------

class Uniform:
    """JAX analogue of torch.distributions.Uniform(h - 0.5, h + 0.5).

    Because the width is exactly 1, sample/log_prob are fused against h
    directly (no bounds traffic).  low/high are materialized lazily through
    the Pallas kernel only when accessed.
    """

    def __init__(self, h):
        self._h = h
        self._bounds = None

    def _materialize(self):
        if self._bounds is None:
            self._bounds = uniform_bounds(self._h)
        return self._bounds

    @property
    def low(self):
        return self._materialize()[0]

    @property
    def high(self):
        return self._materialize()[1]

    def sample(self, key):
        # width == 1  ->  sample = h + (u - 0.5), u ~ U[0, 1)
        u = jax.random.uniform(key, self._h.shape, dtype=self._h.dtype)
        return self._h + (u - 0.5)

    def log_prob(self, value):
        # -log(high - low) = -log(1) = 0 inside the (half-open) support.
        d = value - self._h
        inside = (d >= -0.5) & (d < 0.5)
        return jnp.where(inside, jnp.zeros_like(d), -jnp.inf)


class Posterior:
    """Posterior for P frames (Pallas-backed)."""

    def __init__(self, filter_size=None):
        # No parameters in the reference module.
        pass

    def __call__(self, h):
        # NOTE: bounds are computed in h's dtype (matches torch semantics);
        # for bf16/fp16 inputs with |h| large the +/-0.5 can round away.
        return Uniform(h)


# --------------------------------- main ------------------------------------

if __name__ == "__main__":
    key = jax.random.PRNGKey(0)
    # NCHW, matching PyTorch conv conventions for `h`.
    h = jax.random.normal(key, (2, 4, 16, 16), dtype=jnp.float32)

    posterior = Posterior()
    dist = posterior(h)

    # Materialize bounds through the Pallas kernel and check correctness.
    low, high = dist.low, dist.high
    jax.block_until_ready((low, high))
    assert jnp.allclose(low, h - 0.5, atol=1e-6)
    assert jnp.allclose(high, h + 0.5, atol=1e-6)

    # Exercise the fused sample / log_prob path.
    s = dist.sample(jax.random.PRNGKey(1))
    lp = dist.log_prob(s)
    jax.block_until_ready((s, lp))
    assert bool(jnp.all(s >= low)) and bool(jnp.all(s <= high))
    assert bool(jnp.all(jnp.isfinite(lp)))
    assert bool(jnp.all(lp == 0.0))  # width == 1 -> log_prob == 0 inside

    print("KERNEL_OK")
</pallas_src>

<mosaic_0001>
module attributes {stable_mosaic.version = 11 : i64} {
  func.func @_uniform_bounds_kernel(%arg0: i32, %arg1: memref<8x256xf32, #tpu.memory_space<vmem>>, %arg2: memref<8x256xf32, #tpu.memory_space<vmem>>, %arg3: memref<8x256xf32, #tpu.memory_space<vmem>>) attributes {dimension_semantics = [#tpu.dimension_semantics<parallel>], iteration_bounds = array<i64: 1>, scalar_prefetch = 0 : i64, scratch_operands = 0 : i64, tpu.core_type = #tpu.core_type<tc>, window_params = [{transform_indices = @transform_0, window_bounds = array<i64: 8, 256>}, {transform_indices = @transform_1, window_bounds = array<i64: 8, 256>}, {transform_indices = @transform_2, window_bounds = array<i64: 8, 256>}]} {
    %c0 = arith.constant 0 : index
    %c0_0 = arith.constant 0 : index
    %0 = vector.load %arg1[%c0, %c0_0] : memref<8x256xf32, #tpu.memory_space<vmem>>, vector<8x256xf32>
    %cst = arith.constant 5.000000e-01 : f32
    %1 = vector.broadcast %cst : f32 to vector<8x256xf32>
    %2 = arith.subf %0, %1 : vector<8x256xf32>
    %c0_1 = arith.constant 0 : index
    %c0_2 = arith.constant 0 : index
    %3 = vector.load %arg2[%c0_1, %c0_2] : memref<8x256xf32, #tpu.memory_space<vmem>>, vector<8x256xf32>
    tpu.vector_store %arg2[%c0_1, %c0_2], %2 {strides = array<i32>} : memref<8x256xf32, #tpu.memory_space<vmem>>, vector<8x256xf32>,
    %cst_3 = arith.constant 5.000000e-01 : f32
    %4 = vector.broadcast %cst_3 : f32 to vector<8x256xf32>
    %5 = arith.addf %0, %4 : vector<8x256xf32>
    %c0_4 = arith.constant 0 : index
    %c0_5 = arith.constant 0 : index
    %6 = vector.load %arg3[%c0_4, %c0_5] : memref<8x256xf32, #tpu.memory_space<vmem>>, vector<8x256xf32>
    tpu.vector_store %arg3[%c0_4, %c0_5], %5 {strides = array<i32>} : memref<8x256xf32, #tpu.memory_space<vmem>>, vector<8x256xf32>,
    return
  }
  func.func @transform_0(%arg0: i32) -> (i32, i32) {
    %c0_i32 = arith.constant 0 : i32
    %c0_i32_0 = arith.constant 0 : i32
    return %arg0, %c0_i32 : i32, i32
  }
  func.func @transform_1(%arg0: i32) -> (i32, i32) {
    %c0_i32 = arith.constant 0 : i32
    %c0_i32_0 = arith.constant 0 : i32
    return %arg0, %c0_i32 : i32, i32
  }
  func.func @transform_2(%arg0: i32) -> (i32, i32) {
    %c0_i32 = arith.constant 0 : i32
    %c0_i32_0 = arith.constant 0 : i32
    return %arg0, %c0_i32 : i32, i32
  }
}

</mosaic_0001>

<bundles_post_ra>
// kernel: tpu_custom_call.1
= control target key start
LH: loop header
LB: loop body
LE: loop exit
PB: predicated region body
PF: predicated region fallthrough
CT: control target
= control target key end

     0   :  { %8 = vsyncpa [#allocation3], 0  ;;  %s201_s0 = inlined_call_operand.hbm [shape: f32[8,256], index: 0, kind: input, shape index: {}]   ;;  %s202_s1 = inlined_call_operand.hbm [shape: f32[8,256], index: 1, kind: output, shape index: {0}]   ;;  %s203_s2 = inlined_call_operand.hbm [shape: f32[8,256], index: 2, kind: output, shape index: {1}]  }
   0x1   :  { %9 = vsyncpa [#allocation4], 0 }
   0x2   :  { %10 = vsyncpa [#allocation7], 0  ;;  %s140_s9 = smov [#allocation2]   ;;  %s68_s13 = scalar_lea.hbm %s201_s0, 256 }
   0x3   :  { %s17_s10 = sshll.u32 %s140_s9, 4  ;;  %p69_p0 = scmp.ne.s32.totalorder %s201_s0, %s68_s13  ;;  %s18_s10 = int_to_ptr.vmem [resolvable:$true] %s17_s10 }
   0x4   :  { %p72_p1 = scmp.lt.u32.totalorder %s68_s13, %s201_s0 }
   0x6   :  { %p74_p2 = pnand %p72_p1, %p69_p0 }
   0x8   :  { %77 = shalt.err (!%p74_p2)
}
   0x9   :  { %s78_s18 = scalar_lea.vmem %s18_s10, 256  ;;  %p83_p4 = scmp.lt.s32.totalorder %s18_s10, %s18_s10 }
   0xa   :  { %p79_p3 = scmp.ne.s32.totalorder %s18_s10, %s78_s18  ;;  %p84_p5 = scmp.lt.s32.totalorder %s78_s18, %s78_s18 }
   0xc   :  { %p85_p6 = por %p84_p5, %p83_p4 }
   0xe   :  { %p86_p7 = pnand %p85_p6, %p79_p3 }
  0x10   :  { %89 = shalt.err (!%p86_p7)
}
  0x11   :  { %20 = dma.hbm_to_vmem [thread:$0]  %s201_s0, 256, %s18_s10, [#allocation3]  }
  0x12   :  { %134 = dma.done.wait [#allocation3], 256  }
  0x13   :  { %135 = vsyncadd [#allocation3], 4294967040  ;;  %s141_s21 = smov [#allocation5]   ;;  %s142_s23 = smov [#allocation6]   ;;  %v24_v0 = vld [vmem:[#allocation2] sm:$0xff]  ;;  %v25_v1 = vld [vmem:[#allocation2 + $0x8] sm:$0xff] }
  0x14   :  { %s40_s22 = sshll.u32 %s141_s21, 4  ;;  %s50_s24 = sshll.u32 %s142_s23, 4  ;;  %v63_v2 = vadd.f32 -0.5, %v24_v0  ;;  %v64_v3 = vadd.f32 -0.5, %v25_v1  ;;  %v30_v4 = vadd.f32 0.5, %v24_v0  ;;  %v31_v5 = vadd.f32 0.5, %v25_v1  ;;  %s41_s22 = int_to_ptr.vmem [resolvable:$true] %s40_s22  ;;  %s170_s24 = int_to_ptr.vmem [resolvable:$true] %s50_s24 }
  0x15   :  { %s90_s0 = scalar_lea.vmem %s41_s22, 256  ;;  %p95_p9 = scmp.lt.s32.totalorder %s41_s22, %s41_s22 }
  0x16   :  { %28 = vst [vmem:[#allocation5] sm:$0xff] %v63_v2  ;;  %29 = vst [vmem:[#allocation5 + $0x8] sm:$0xff] %v64_v3  ;;  %p91_p8 = scmp.ne.s32.totalorder %s41_s22, %s90_s0  ;;  %p96_p10 = scmp.lt.s32.totalorder %s90_s0, %s90_s0 }
  0x17   :  { %32 = vst [vmem:[#allocation6] sm:$0xff] %v30_v4  ;;  %33 = vst [vmem:[#allocation6 + $0x8] sm:$0xff] %v31_v5 }
  0x18   :  { %p97_p11 = por %p96_p10, %p95_p9 }
  0x1a   :  { %p98_p12 = pnand %p97_p11, %p91_p8 }
  0x1c   :  { %101 = shalt.err (!%p98_p12)
}
  0x1d   :  { %s102_s27 = scalar_lea.hbm %s202_s1, 256 }
  0x1e   :  { %p103_p13 = scmp.ne.s32.totalorder %s202_s1, %s102_s27  ;;  %p106_p0 = scmp.lt.u32.totalorder %s102_s27, %s202_s1 }
  0x20   :  { %p108_p1 = pnand %p106_p0, %p103_p13 }
  0x22   :  { %111 = shalt.err (!%p108_p1)
}
  0x23   :  { %43 = dma.vmem_to_hbm [thread:$0]  %s41_s22, 256, %s202_s1, [#allocation4]  }
  0x24   :  { %s112_s6 = scalar_lea.vmem %s170_s24, 256  ;;  %p117_p3 = scmp.lt.s32.totalorder %s170_s24, %s170_s24 }
  0x25   :  { %p113_p2 = scmp.ne.s32.totalorder %s170_s24, %s112_s6  ;;  %p118_p4 = scmp.lt.s32.totalorder %s112_s6, %s112_s6 }
  0x27   :  { %p119_p5 = por %p118_p4, %p117_p3 }
  0x29   :  { %p120_p6 = pnand %p119_p5, %p113_p2 }
  0x2b   :  { %123 = shalt.err (!%p120_p6)
}
  0x2c   :  { %s124_s9 = scalar_lea.hbm %s203_s2, 256 }
  0x2d   :  { %p125_p7 = scmp.ne.s32.totalorder %s203_s2, %s124_s9  ;;  %p128_p8 = scmp.lt.u32.totalorder %s124_s9, %s203_s2 }
  0x2f   :  { %p130_p9 = pnand %p128_p8, %p125_p7 }
  0x31   :  { %133 = shalt.err (!%p130_p9)
}
  0x32   :  { %53 = dma.vmem_to_hbm [thread:$0]  %s170_s24, 256, %s203_s2, [#allocation7]  }
  0x33   :  { %136 = dma.done.wait [#allocation4], 256  }
  0x34   :  { %137 = vsyncadd [#allocation4], 4294967040 }
  0x35   :  { %138 = dma.done.wait [#allocation7], 256  }
  0x36   :  { %139 = vsyncadd [#allocation7], 4294967040 }
  0x37   :  { %60 = vsyncpa [#allocation3], 1 }
  0x38   :  { %61 = vsyncpa [#allocation4], 1 }
  0x39   :  { %62 = vsyncpa [#allocation7], 1 }

</bundles_post_ra>
